<compile_context>
chip_gen: v5e
topology: v5e:2x2
jax: 0.10.0
libtpu: 0.0.40
codegen_flags: <defaults>
</compile_context>

<pallas_src>
import functools

import numpy as np

import jax
import jax.numpy as jnp
from jax import lax
from jax.experimental import pallas as pl
from jax.experimental.pallas import tpu as pltpu


class HysteresisError(Exception):
    pass


_TIME_BLOCK = 1024     # time steps per grid iteration (multiple of 128 -> lane-dense out)
_TILE = 16             # serial-loop tile: 16 bf16 rows == one packed vreg tile


def _round_up(x, m):
    return ((x + m - 1) // m) * m


# ----------------------------------------------------------------------------
# Pallas kernel: soft Preisach state recurrence + deferred MXU reduction
# ----------------------------------------------------------------------------
def _preisach_kernel(params_smem, alpha_ref, beta_ref, dens_ref,
                     sgn_ref, sf_ref, hrow_ref, out_ref,
                     state_ref, st_ref):
    # params_smem : (3,)          f32  [offset, slope, scale / sum(density)]  (SMEM)
    # alpha_ref   : (1, Npad)     f32  alpha thresholds / temp                (VMEM)
    # beta_ref    : (1, Npad)     f32  beta  thresholds / temp                (VMEM)
    # dens_ref    : (1, Npad)     bf16 hysterion density (padded lanes = 0)   (VMEM)
    # sgn_ref     : (T_BLK, 1)    f32  +1 (field increasing) / -1 (decreasing)(VMEM)
    # sf_ref      : (T_BLK, 1)    f32  sgn_t * norm_h_t / temp                (VMEM)
    # hrow_ref    : (1, T_BLK)    f32  norm_h (this block, epilogue)          (VMEM)
    # out_ref     : (1, T_BLK)    f32  magnetization (this block)             (VMEM)
    # state_ref   : (1, Npad)     f32  persistent hysteron state              (scratch)
    # st_ref      : (T_BLK, Npad) bf16 per-step states of this block          (scratch)
    i = pl.program_id(0)
    t_blk = st_ref.shape[0]
    offset = params_smem[0]
    slope = params_smem[1]
    mscale = params_smem[2]

    # First grid step: start from negative saturation.
    @pl.when(i == 0)
    def _():
        state_ref[...] = jnp.full(state_ref.shape, -1.0, dtype=state_ref.dtype)

    # Loop-invariant threshold rows.  With sgn in {+1,-1}:
    #   thr_sel = inc ? alpha : -beta  ==  d1 + sgn * d2,
    #   d1 = (alpha - beta)/2,  d2 = (alpha + beta)/2   (all pre-scaled by 1/temp)
    # so  arg = sgn*(f - thr)/temp = sf - (d1 + sgn*d2)  — no vselect needed.
    d1 = 0.5 * (alpha_ref[...] - beta_ref[...])      # (1, Npad)
    d2 = 0.5 * (alpha_ref[...] + beta_ref[...])      # (1, Npad)

    n_tiles = t_blk // _TILE

    def tile_body(tb, state):
        base = pl.multiple_of(tb * _TILE, _TILE)
        # ---- batched, state-independent precompute for 16 steps -------------
        sg = sgn_ref[pl.ds(base, _TILE), :]          # (16, 1)
        sf = sf_ref[pl.ds(base, _TILE), :]           # (16, 1)
        arg = sf - (d1 + sg * d2)                    # (16, Npad) broadcast
        btile = jax.nn.sigmoid(arg) * sg             # B = sgn * sigmoid(arg)
        # ---- serial recurrence: two VPU fmas per step ------------------------
        #   increasing: s + sig*(1 - s)   decreasing: s - sig*(1 + s)
        #   both:       s*(1 - |B|) + B
        rows = []
        for j in range(_TILE):                       # static unroll of 16
            b_row = btile[j:j + 1, :]                # (1, Npad)
            state = state * (1.0 - jnp.abs(b_row)) + b_row
            rows.append(state)
        tile = jnp.concatenate(rows, axis=0)         # (16, Npad) assembled in vregs
        # one aligned (16, Npad) bf16 store per 16 steps (no masked row stores)
        st_ref[pl.ds(base, _TILE), :] = tile.astype(st_ref.dtype)
        return state

    unroll = 2 if (n_tiles % 2 == 0) else 1
    state = lax.fori_loop(0, n_tiles, tile_body, state_ref[...], unroll=unroll)
    state_ref[...] = state                           # carry across time blocks

    # Deferred density-weighted reduction: one bf16 MXU matmul per time block,
    # contracting the hysteron axis -> lane-dense (1, T_BLK) row.  Padded
    # hysteron lanes carry exactly 0 density so they never leak into the sum.
    m_row = lax.dot_general(
        dens_ref[...], st_ref[...],
        dimension_numbers=(((1,), (1,)), ((), ())),
        preferred_element_type=jnp.float32)
    out_ref[...] = m_row * mscale + offset + slope * hrow_ref[...]


# ----------------------------------------------------------------------------
# Jitted forward: normalization + per-step (state-independent) prep + kernel
# ----------------------------------------------------------------------------
@jax.jit
def _hysteresis_forward(x, domain, inv_temp, alpha_s, beta_s, dens_bf16, params):
    t_len = x.shape[0]
    n_pad = alpha_s.shape[1]
    lo = domain[0]
    hi = domain[1]
    norm_h = (x - lo) / (hi - lo)                    # HysteresisTransform.transform

    if t_len <= _TIME_BLOCK:
        t_blk = _round_up(max(t_len, 1), _TILE)      # single block
    else:
        t_blk = _TIME_BLOCK                          # multi-block serial time grid
    t_pad = _round_up(t_len, t_blk)
    if t_pad != t_len:
        # edge-pad the tail; padded outputs are computed but sliced away
        norm_h = jnp.pad(norm_h, (0, t_pad - t_len), mode="edge")

    # State-independent per-step quantities (tiny elementwise pass, fused by XLA).
    # prev field for t=0 is 0.0 (negative saturation, matches the reference).
    prev = jnp.concatenate([jnp.zeros((1,), norm_h.dtype), norm_h[:-1]])
    sgn = jnp.where(norm_h >= prev, jnp.float32(1.0), jnp.float32(-1.0))
    sf = sgn * norm_h * inv_temp
    sgn_col = sgn.reshape(t_pad, 1)
    sf_col = sf.reshape(t_pad, 1)
    h_row = norm_h.reshape(1, t_pad)

    n_blocks = t_pad // t_blk
    out = pl.pallas_call(
        _preisach_kernel,
        out_shape=jax.ShapeDtypeStruct((1, t_pad), jnp.float32),
        grid=(n_blocks,),
        in_specs=[
            pl.BlockSpec(memory_space=pltpu.MemorySpace.SMEM),   # params [off, slope, mscale]
            pl.BlockSpec((1, n_pad), lambda i: (0, 0)),          # alpha / temp
            pl.BlockSpec((1, n_pad), lambda i: (0, 0)),          # beta  / temp
            pl.BlockSpec((1, n_pad), lambda i: (0, 0)),          # density (bf16)
            pl.BlockSpec((t_blk, 1), lambda i: (i, 0)),          # sgn column (block)
            pl.BlockSpec((t_blk, 1), lambda i: (i, 0)),          # sgn*f/temp column (block)
            pl.BlockSpec((1, t_blk), lambda i: (0, i)),          # norm_h row (block)
        ],
        out_specs=pl.BlockSpec((1, t_blk), lambda i: (0, i)),
        scratch_shapes=[
            pltpu.VMEM((1, n_pad), jnp.float32),        # persistent hysteron state
            pltpu.VMEM((t_blk, n_pad), jnp.bfloat16),   # per-step states (block)
        ],
        compiler_params=pltpu.CompilerParams(
            dimension_semantics=("arbitrary",)),        # serial time recurrence
    )(params, alpha_s, beta_s, dens_bf16, sgn_col, sf_col, h_row)
    return out[0, :t_len]


# ----------------------------------------------------------------------------
# Module-level glue (mesh, constraint transforms, normalization)
# ----------------------------------------------------------------------------
def create_triangle_mesh(mesh_scale: float = 1.0):
    """Uniform triangular mesh on the unit Preisach plane {0 <= beta <= alpha <= 1}."""
    # TODO(synk): the original create_triangle_mesh uses an adaptive density
    # function (fine near alpha==beta, ~111 points at scale 1.0); a uniform
    # grid (120 points at scale 1.0) is used here instead.
    levels = int(round(14 / mesh_scale)) + 1
    xs = np.linspace(0.0, 1.0, levels)
    pts = [(a, b) for a in xs for b in xs if b <= a + 1e-12]
    return np.array(pts, dtype=np.float32)  # columns: (alpha, beta)


def _interval_transform(raw, lower, upper):
    # gpytorch.constraints.Interval: lower + (upper - lower) * sigmoid(raw)
    return lower + (upper - lower) * jax.nn.sigmoid(raw)


class BaseHysteresisPallas:
    """JAX/Pallas re-implementation of BaseHysteresis.forward (REGRESSION mode)."""

    def __init__(self, mesh_scale: float = 1.0, temp: float = 0.01,
                 fixed_domain=(-1.0, 1.0)):
        self.temp = float(temp)
        self.fixed_domain = (float(fixed_domain[0]), float(fixed_domain[1]))

        mesh = create_triangle_mesh(mesh_scale)               # (N, 2) = (alpha, beta)
        self.mesh_points = jnp.asarray(mesh, jnp.float32)
        n = mesh.shape[0]

        # Parameters initialised exactly as in __init__ (raw zeros; offset=0,
        # scale=1, slope=1 via the constraint setters).
        raw_hysterion_density = jnp.zeros((n,), jnp.float32)
        self.hysterion_density = _interval_transform(raw_hysterion_density, 0.0, 1.0)
        self.offset = 0.0
        self.scale = 1.0
        self.slope = 1.0

        # Pad hysterons to a lane multiple.  Padded thresholds never switch and
        # padded density is exactly 0.0, so padded lanes cannot leak into the
        # deferred matmul reduction.
        n_pad = _round_up(n, 128)
        pad = n_pad - n
        inv_temp = 1.0 / self.temp
        alpha_s = np.pad(mesh[:, 0], (0, pad), constant_values=2.0) * inv_temp
        beta_s = np.pad(mesh[:, 1], (0, pad), constant_values=-1.0) * inv_temp
        dens = np.pad(np.asarray(self.hysterion_density), (0, pad),
                      constant_values=0.0)
        self._alpha_s = jnp.asarray(alpha_s, jnp.float32).reshape(1, n_pad)
        self._beta_s = jnp.asarray(beta_s, jnp.float32).reshape(1, n_pad)
        self._dens_bf16 = jnp.asarray(dens, jnp.bfloat16).reshape(1, n_pad)
        # Normalization kept in f32 and applied as a scalar in the epilogue, so
        # the bf16 density row does not bias sum(density).
        self._dens_sum = float(np.sum(dens))

    @property
    def n_mesh_points(self):
        return int(self.mesh_points.shape[0])

    def _check_inside_valid_domain(self, values):
        machine_error = 1e-4
        lo, hi = self.fixed_domain
        v = np.asarray(values)
        if np.any(v < lo - machine_error) or np.any(v > hi + machine_error):
            raise HysteresisError(
                f"Argument values are not inside valid domain ({[lo, hi]}) "
                f"for this model! Offending tensor is {v}")

    def forward(self, x, check_domain: bool = False):
        """REGRESSION-mode forward: x is a 1-D sequence of applied fields."""
        x = jnp.asarray(x, jnp.float32)
        if x.ndim != 1:
            raise ValueError("input must be a 1D field sequence")
        if check_domain:
            # NOTE: forces a blocking device->host sync; opt-in only (perf).
            self._check_inside_valid_domain(np.asarray(x))

        domain = jnp.asarray(self.fixed_domain, jnp.float32)
        inv_temp = jnp.float32(1.0 / self.temp)
        params = jnp.array(
            [self.offset, self.slope, self.scale / self._dens_sum],
            dtype=jnp.float32)
        return _hysteresis_forward(x, domain, inv_temp, self._alpha_s,
                                   self._beta_s, self._dens_bf16, params)

    # Pure-JAX reference of the same math (canonical two-branch form), for
    # verification only.
    def forward_reference(self, x):
        x = jnp.asarray(x, jnp.float32)
        lo, hi = self.fixed_domain
        nh = (x - lo) / (hi - lo)
        alpha = self.mesh_points[:, 0]
        beta = self.mesh_points[:, 1]
        dens = self.hysterion_density
        temp = jnp.float32(self.temp)
        scale = jnp.float32(self.scale)
        offset = jnp.float32(self.offset)
        slope = jnp.float32(self.slope)

        def step(carry, f):
            prev, state = carry
            up = state + (1.0 - state) * jax.nn.sigmoid((f - alpha) / temp)
            dn = state - (state + 1.0) * jax.nn.sigmoid((beta - f) / temp)
            state = jnp.where(f >= prev, up, dn)
            m = jnp.sum(dens * state) / jnp.sum(dens)
            out = scale * m + offset + f * slope
            return (f, state), out

        init = (jnp.float32(0.0), -jnp.ones_like(alpha))
        (_, _), outs = lax.scan(step, init, nh)
        return outs


if __name__ == "__main__":
    key = jax.random.PRNGKey(0)
    k1, k2 = jax.random.split(key)

    model = BaseHysteresisPallas(mesh_scale=1.0, temp=0.01, fixed_domain=(-1.0, 1.0))

    # Small sequence (single time block).
    x_small = jax.random.uniform(k1, (8,), minval=-1.0, maxval=1.0,
                                 dtype=jnp.float32)
    out_small = jax.block_until_ready(model.forward(x_small))
    ref_small = model.forward_reference(x_small)
    assert out_small.shape == x_small.shape
    np.testing.assert_allclose(np.asarray(out_small), np.asarray(ref_small),
                               rtol=5e-3, atol=5e-3)

    # Longer sequence exercising the multi-block serial time grid + edge padding.
    x_long = jax.random.uniform(k2, (2500,), minval=-1.0, maxval=1.0,
                                dtype=jnp.float32)
    out_long = jax.block_until_ready(model.forward(x_long))
    ref_long = model.forward_reference(x_long)
    assert out_long.shape == x_long.shape
    # Tolerance covers bf16-stored states (<=~2e-3) + f32 vs f64 drift at temp=0.01.
    np.testing.assert_allclose(np.asarray(out_long), np.asarray(ref_long),
                               rtol=5e-3, atol=5e-3)

    print("KERNEL_OK")
</pallas_src>

<mosaic_0001>
module attributes {stable_mosaic.version = 11 : i64} {
  func.func @_preisach_kernel(%arg0: i32, %arg1: memref<3xf32, #tpu.memory_space<smem>>, %arg2: memref<1x128xf32, #tpu.memory_space<vmem>>, %arg3: memref<1x128xf32, #tpu.memory_space<vmem>>, %arg4: memref<1x128xbf16, #tpu.memory_space<vmem>>, %arg5: memref<16x1xf32, #tpu.memory_space<vmem>>, %arg6: memref<16x1xf32, #tpu.memory_space<vmem>>, %arg7: memref<1x16xf32, #tpu.memory_space<vmem>>, %arg8: memref<1x16xf32, #tpu.memory_space<vmem>>, %arg9: memref<1x128xf32, #tpu.memory_space<vmem>>, %arg10: memref<16x128xbf16, #tpu.memory_space<vmem>>) attributes {dimension_semantics = [#tpu.dimension_semantics<arbitrary>], iteration_bounds = array<i64: 1>, scalar_prefetch = 0 : i64, scratch_operands = 2 : i64, tpu.core_type = #tpu.core_type<tc>, window_params = [{transform_indices = @transform_0, window_bounds = array<i64: 3>}, {pipeline_mode = #tpu.pipeline_mode<synchronous>, transform_indices = @transform_1, window_bounds = array<i64: 1, 128>}, {pipeline_mode = #tpu.pipeline_mode<synchronous>, transform_indices = @transform_2, window_bounds = array<i64: 1, 128>}, {pipeline_mode = #tpu.pipeline_mode<synchronous>, transform_indices = @transform_3, window_bounds = array<i64: 1, 128>}, {transform_indices = @transform_4, window_bounds = array<i64: 16, 1>}, {transform_indices = @transform_5, window_bounds = array<i64: 16, 1>}, {transform_indices = @transform_6, window_bounds = array<i64: 1, 16>}, {transform_indices = @transform_7, window_bounds = array<i64: 1, 16>}]} {
    %c0 = arith.constant 0 : index
    %0 = memref.load %arg1[%c0] : memref<3xf32, #tpu.memory_space<smem>>
    %c1 = arith.constant 1 : index
    %1 = memref.load %arg1[%c1] : memref<3xf32, #tpu.memory_space<smem>>
    %c2 = arith.constant 2 : index
    %2 = memref.load %arg1[%c2] : memref<3xf32, #tpu.memory_space<smem>>
    %c0_i32 = arith.constant 0 : i32
    %3 = arith.cmpi eq, %arg0, %c0_i32 : i32
    %4 = arith.extui %3 : i1 to i32
    %c0_i32_0 = arith.constant 0 : i32
    %5 = arith.cmpi ne, %4, %c0_i32_0 : i32
    scf.if %5 {
      %cst_44 = arith.constant -1.000000e+00 : f32
      %150 = vector.broadcast %cst_44 : f32 to vector<1x128xf32>
      %c0_45 = arith.constant 0 : index
      %c0_46 = arith.constant 0 : index
      %151 = vector.load %arg9[%c0_45, %c0_46] : memref<1x128xf32, #tpu.memory_space<vmem>>, vector<1x128xf32>
      tpu.vector_store %arg9[%c0_45, %c0_46], %150 {strides = array<i32>} : memref<1x128xf32, #tpu.memory_space<vmem>>, vector<1x128xf32>,
    } else {
    }
    %c0_1 = arith.constant 0 : index
    %c0_2 = arith.constant 0 : index
    %6 = vector.load %arg2[%c0_1, %c0_2] : memref<1x128xf32, #tpu.memory_space<vmem>>, vector<1x128xf32>
    %c0_3 = arith.constant 0 : index
    %c0_4 = arith.constant 0 : index
    %7 = vector.load %arg3[%c0_3, %c0_4] : memref<1x128xf32, #tpu.memory_space<vmem>>, vector<1x128xf32>
    %8 = arith.subf %6, %7 : vector<1x128xf32>
    %cst = arith.constant 5.000000e-01 : f32
    %9 = vector.broadcast %cst : f32 to vector<1x128xf32>
    %10 = arith.mulf %9, %8 : vector<1x128xf32>
    %c0_5 = arith.constant 0 : index
    %c0_6 = arith.constant 0 : index
    %11 = vector.load %arg2[%c0_5, %c0_6] : memref<1x128xf32, #tpu.memory_space<vmem>>, vector<1x128xf32>
    %c0_7 = arith.constant 0 : index
    %c0_8 = arith.constant 0 : index
    %12 = vector.load %arg3[%c0_7, %c0_8] : memref<1x128xf32, #tpu.memory_space<vmem>>, vector<1x128xf32>
    %13 = arith.addf %11, %12 : vector<1x128xf32>
    %cst_9 = arith.constant 5.000000e-01 : f32
    %14 = vector.broadcast %cst_9 : f32 to vector<1x128xf32>
    %15 = arith.mulf %14, %13 : vector<1x128xf32>
    %c0_10 = arith.constant 0 : index
    %c0_11 = arith.constant 0 : index
    %16 = vector.load %arg9[%c0_10, %c0_11] : memref<1x128xf32, #tpu.memory_space<vmem>>, vector<1x128xf32>
    %c0_i32_12 = arith.constant 0 : i32
    %c16_i32 = arith.constant 16 : i32
    %17 = arith.muli %c0_i32_12, %c16_i32 : i32
    %18 = tpu.assume_multiple %17, 16 : i32
    %19 = arith.index_cast %18 : i32 to index
    %c0_13 = arith.constant 0 : index
    %20 = vector.load %arg5[%19, %c0_13] : memref<16x1xf32, #tpu.memory_space<vmem>>, vector<16x1xf32>
    %21 = arith.index_cast %18 : i32 to index
    %c0_14 = arith.constant 0 : index
    %22 = vector.load %arg6[%21, %c0_14] : memref<16x1xf32, #tpu.memory_space<vmem>>, vector<16x1xf32>
    %23 = vector.broadcast %20 : vector<16x1xf32> to vector<16x128xf32>
    %24 = vector.broadcast %15 : vector<1x128xf32> to vector<16x128xf32>
    %25 = arith.mulf %23, %24 : vector<16x128xf32>
    %26 = vector.broadcast %10 : vector<1x128xf32> to vector<16x128xf32>
    %27 = arith.addf %26, %25 : vector<16x128xf32>
    %28 = vector.broadcast %22 : vector<16x1xf32> to vector<16x128xf32>
    %29 = arith.subf %28, %27 : vector<16x128xf32>
    %30 = arith.negf %29 : vector<16x128xf32>
    %31 = math.exp %30 : vector<16x128xf32>
    %cst_15 = arith.constant 1.000000e+00 : f32
    %32 = vector.broadcast %cst_15 : f32 to vector<16x128xf32>
    %33 = arith.addf %32, %31 : vector<16x128xf32>
    %34 = arith.divf %32, %33 : vector<16x128xf32>
    %35 = vector.broadcast %20 : vector<16x1xf32> to vector<16x128xf32>
    %36 = arith.mulf %34, %35 : vector<16x128xf32>
    %37 = vector.extract_strided_slice %36 {offsets = [0, 0], sizes = [1, 128], strides = [1, 1]} : vector<16x128xf32> to vector<1x128xf32>
    %38 = math.absf %37 : vector<1x128xf32>
    %cst_16 = arith.constant 1.000000e+00 : f32
    %39 = vector.broadcast %cst_16 : f32 to vector<1x128xf32>
    %40 = arith.subf %39, %38 : vector<1x128xf32>
    %41 = arith.mulf %16, %40 : vector<1x128xf32>
    %42 = arith.addf %41, %37 : vector<1x128xf32>
    %43 = vector.extract_strided_slice %36 {offsets = [1, 0], sizes = [1, 128], strides = [1, 1]} : vector<16x128xf32> to vector<1x128xf32>
    %44 = math.absf %43 : vector<1x128xf32>
    %cst_17 = arith.constant 1.000000e+00 : f32
    %45 = vector.broadcast %cst_17 : f32 to vector<1x128xf32>
    %46 = arith.subf %45, %44 : vector<1x128xf32>
    %47 = arith.mulf %42, %46 : vector<1x128xf32>
    %48 = arith.addf %47, %43 : vector<1x128xf32>
    %49 = vector.extract_strided_slice %36 {offsets = [2, 0], sizes = [1, 128], strides = [1, 1]} : vector<16x128xf32> to vector<1x128xf32>
    %50 = math.absf %49 : vector<1x128xf32>
    %cst_18 = arith.constant 1.000000e+00 : f32
    %51 = vector.broadcast %cst_18 : f32 to vector<1x128xf32>
    %52 = arith.subf %51, %50 : vector<1x128xf32>
    %53 = arith.mulf %48, %52 : vector<1x128xf32>
    %54 = arith.addf %53, %49 : vector<1x128xf32>
    %55 = vector.extract_strided_slice %36 {offsets = [3, 0], sizes = [1, 128], strides = [1, 1]} : vector<16x128xf32> to vector<1x128xf32>
    %56 = math.absf %55 : vector<1x128xf32>
    %cst_19 = arith.constant 1.000000e+00 : f32
    %57 = vector.broadcast %cst_19 : f32 to vector<1x128xf32>
    %58 = arith.subf %57, %56 : vector<1x128xf32>
    %59 = arith.mulf %54, %58 : vector<1x128xf32>
    %60 = arith.addf %59, %55 : vector<1x128xf32>
    %61 = vector.extract_strided_slice %36 {offsets = [4, 0], sizes = [1, 128], strides = [1, 1]} : vector<16x128xf32> to vector<1x128xf32>
    %62 = math.absf %61 : vector<1x128xf32>
    %cst_20 = arith.constant 1.000000e+00 : f32
    %63 = vector.broadcast %cst_20 : f32 to vector<1x128xf32>
    %64 = arith.subf %63, %62 : vector<1x128xf32>
    %65 = arith.mulf %60, %64 : vector<1x128xf32>
    %66 = arith.addf %65, %61 : vector<1x128xf32>
    %67 = vector.extract_strided_slice %36 {offsets = [5, 0], sizes = [1, 128], strides = [1, 1]} : vector<16x128xf32> to vector<1x128xf32>
    %68 = math.absf %67 : vector<1x128xf32>
    %cst_21 = arith.constant 1.000000e+00 : f32
    %69 = vector.broadcast %cst_21 : f32 to vector<1x128xf32>
    %70 = arith.subf %69, %68 : vector<1x128xf32>
    %71 = arith.mulf %66, %70 : vector<1x128xf32>
    %72 = arith.addf %71, %67 : vector<1x128xf32>
    %73 = vector.extract_strided_slice %36 {offsets = [6, 0], sizes = [1, 128], strides = [1, 1]} : vector<16x128xf32> to vector<1x128xf32>
    %74 = math.absf %73 : vector<1x128xf32>
    %cst_22 = arith.constant 1.000000e+00 : f32
    %75 = vector.broadcast %cst_22 : f32 to vector<1x128xf32>
    %76 = arith.subf %75, %74 : vector<1x128xf32>
    %77 = arith.mulf %72, %76 : vector<1x128xf32>
    %78 = arith.addf %77, %73 : vector<1x128xf32>
    %79 = vector.extract_strided_slice %36 {offsets = [7, 0], sizes = [1, 128], strides = [1, 1]} : vector<16x128xf32> to vector<1x128xf32>
    %80 = math.absf %79 : vector<1x128xf32>
    %cst_23 = arith.constant 1.000000e+00 : f32
    %81 = vector.broadcast %cst_23 : f32 to vector<1x128xf32>
    %82 = arith.subf %81, %80 : vector<1x128xf32>
    %83 = arith.mulf %78, %82 : vector<1x128xf32>
    %84 = arith.addf %83, %79 : vector<1x128xf32>
    %85 = vector.extract_strided_slice %36 {offsets = [8, 0], sizes = [1, 128], strides = [1, 1]} : vector<16x128xf32> to vector<1x128xf32>
    %86 = math.absf %85 : vector<1x128xf32>
    %cst_24 = arith.constant 1.000000e+00 : f32
    %87 = vector.broadcast %cst_24 : f32 to vector<1x128xf32>
    %88 = arith.subf %87, %86 : vector<1x128xf32>
    %89 = arith.mulf %84, %88 : vector<1x128xf32>
    %90 = arith.addf %89, %85 : vector<1x128xf32>
    %91 = vector.extract_strided_slice %36 {offsets = [9, 0], sizes = [1, 128], strides = [1, 1]} : vector<16x128xf32> to vector<1x128xf32>
    %92 = math.absf %91 : vector<1x128xf32>
    %cst_25 = arith.constant 1.000000e+00 : f32
    %93 = vector.broadcast %cst_25 : f32 to vector<1x128xf32>
    %94 = arith.subf %93, %92 : vector<1x128xf32>
    %95 = arith.mulf %90, %94 : vector<1x128xf32>
    %96 = arith.addf %95, %91 : vector<1x128xf32>
    %97 = vector.extract_strided_slice %36 {offsets = [10, 0], sizes = [1, 128], strides = [1, 1]} : vector<16x128xf32> to vector<1x128xf32>
    %98 = math.absf %97 : vector<1x128xf32>
    %cst_26 = arith.constant 1.000000e+00 : f32
    %99 = vector.broadcast %cst_26 : f32 to vector<1x128xf32>
    %100 = arith.subf %99, %98 : vector<1x128xf32>
    %101 = arith.mulf %96, %100 : vector<1x128xf32>
    %102 = arith.addf %101, %97 : vector<1x128xf32>
    %103 = vector.extract_strided_slice %36 {offsets = [11, 0], sizes = [1, 128], strides = [1, 1]} : vector<16x128xf32> to vector<1x128xf32>
    %104 = math.absf %103 : vector<1x128xf32>
    %cst_27 = arith.constant 1.000000e+00 : f32
    %105 = vector.broadcast %cst_27 : f32 to vector<1x128xf32>
    %106 = arith.subf %105, %104 : vector<1x128xf32>
    %107 = arith.mulf %102, %106 : vector<1x128xf32>
    %108 = arith.addf %107, %103 : vector<1x128xf32>
    %109 = vector.extract_strided_slice %36 {offsets = [12, 0], sizes = [1, 128], strides = [1, 1]} : vector<16x128xf32> to vector<1x128xf32>
    %110 = math.absf %109 : vector<1x128xf32>
    %cst_28 = arith.constant 1.000000e+00 : f32
    %111 = vector.broadcast %cst_28 : f32 to vector<1x128xf32>
    %112 = arith.subf %111, %110 : vector<1x128xf32>
    %113 = arith.mulf %108, %112 : vector<1x128xf32>
    %114 = arith.addf %113, %109 : vector<1x128xf32>
    %115 = vector.extract_strided_slice %36 {offsets = [13, 0], sizes = [1, 128], strides = [1, 1]} : vector<16x128xf32> to vector<1x128xf32>
    %116 = math.absf %115 : vector<1x128xf32>
    %cst_29 = arith.constant 1.000000e+00 : f32
    %117 = vector.broadcast %cst_29 : f32 to vector<1x128xf32>
    %118 = arith.subf %117, %116 : vector<1x128xf32>
    %119 = arith.mulf %114, %118 : vector<1x128xf32>
    %120 = arith.addf %119, %115 : vector<1x128xf32>
    %121 = vector.extract_strided_slice %36 {offsets = [14, 0], sizes = [1, 128], strides = [1, 1]} : vector<16x128xf32> to vector<1x128xf32>
    %122 = math.absf %121 : vector<1x128xf32>
    %cst_30 = arith.constant 1.000000e+00 : f32
    %123 = vector.broadcast %cst_30 : f32 to vector<1x128xf32>
    %124 = arith.subf %123, %122 : vector<1x128xf32>
    %125 = arith.mulf %120, %124 : vector<1x128xf32>
    %126 = arith.addf %125, %121 : vector<1x128xf32>
    %127 = vector.extract_strided_slice %36 {offsets = [15, 0], sizes = [1, 128], strides = [1, 1]} : vector<16x128xf32> to vector<1x128xf32>
    %128 = math.absf %127 : vector<1x128xf32>
    %cst_31 = arith.constant 1.000000e+00 : f32
    %129 = vector.broadcast %cst_31 : f32 to vector<1x128xf32>
    %130 = arith.subf %129, %128 : vector<1x128xf32>
    %131 = arith.mulf %126, %130 : vector<1x128xf32>
    %132 = arith.addf %131, %127 : vector<1x128xf32>
    %133 = tpu.concatenate %42, %48, %54, %60, %66, %72, %78, %84, %90, %96, %102, %108, %114, %120, %126, %132 in 0 : vector<1x128xf32>, vector<1x128xf32>, vector<1x128xf32>, vector<1x128xf32>, vector<1x128xf32>, vector<1x128xf32>, vector<1x128xf32>, vector<1x128xf32>, vector<1x128xf32>, vector<1x128xf32>, vector<1x128xf32>, vector<1x128xf32>, vector<1x128xf32>, vector<1x128xf32>, vector<1x128xf32>, vector<1x128xf32> -> vector<16x128xf32>
    %134 = arith.truncf %133 : vector<16x128xf32> to vector<16x128xbf16>
    %135 = arith.index_cast %18 : i32 to index
    %c0_32 = arith.constant 0 : index
    %136 = vector.load %arg10[%135, %c0_32] : memref<16x128xbf16, #tpu.memory_space<vmem>>, vector<16x128xbf16>
    tpu.vector_store %arg10[%135, %c0_32], %134 {strides = array<i32>} : memref<16x128xbf16, #tpu.memory_space<vmem>>, vector<16x128xbf16>,
    %c1_i32 = arith.constant 1 : i32
    %c0_33 = arith.constant 0 : index
    %c0_34 = arith.constant 0 : index
    %137 = vector.load %arg9[%c0_33, %c0_34] : memref<1x128xf32, #tpu.memory_space<vmem>>, vector<1x128xf32>
    tpu.vector_store %arg9[%c0_33, %c0_34], %132 {strides = array<i32>} : memref<1x128xf32, #tpu.memory_space<vmem>>, vector<1x128xf32>,
    %c0_35 = arith.constant 0 : index
    %c0_36 = arith.constant 0 : index
    %138 = vector.load %arg4[%c0_35, %c0_36] : memref<1x128xbf16, #tpu.memory_space<vmem>>, vector<1x128xbf16>
    %c0_37 = arith.constant 0 : index
    %c0_38 = arith.constant 0 : index
    %139 = vector.load %arg10[%c0_37, %c0_38] : memref<16x128xbf16, #tpu.memory_space<vmem>>, vector<16x128xbf16>
    %cst_39 = arith.constant dense<0.000000e+00> : vector<1x16xf32>
    %140 = tpu.matmul %138, %139, %cst_39 {dimension_numbers = #tpu.dot_dimension_numbers<[1], [1], [0], [0], [0, 0, 1, 0], [], []>} : vector<1x128xbf16>, vector<16x128xbf16>, vector<1x16xf32> -> vector<1x16xf32>
    %141 = vector.broadcast %2 : f32 to vector<1x16xf32>
    %142 = arith.mulf %140, %141 : vector<1x16xf32>
    %143 = vector.broadcast %0 : f32 to vector<1x16xf32>
    %144 = arith.addf %142, %143 : vector<1x16xf32>
    %c0_40 = arith.constant 0 : index
    %c0_41 = arith.constant 0 : index
    %145 = vector.load %arg7[%c0_40, %c0_41] : memref<1x16xf32, #tpu.memory_space<vmem>>, vector<1x16xf32>
    %146 = vector.broadcast %1 : f32 to vector<1x16xf32>
    %147 = arith.mulf %146, %145 : vector<1x16xf32>
    %148 = arith.addf %144, %147 : vector<1x16xf32>
    %c0_42 = arith.constant 0 : index
    %c0_43 = arith.constant 0 : index
    %149 = vector.load %arg8[%c0_42, %c0_43] : memref<1x16xf32, #tpu.memory_space<vmem>>, vector<1x16xf32>
    tpu.vector_store %arg8[%c0_42, %c0_43], %148 {strides = array<i32>} : memref<1x16xf32, #tpu.memory_space<vmem>>, vector<1x16xf32>,
    return
  }
  func.func @transform_0(%arg0: i32) -> i32 {
    %c0_i32 = arith.constant 0 : i32
    %c0_i32_0 = arith.constant 0 : i32
    return %c0_i32 : i32
  }
  func.func @transform_1(%arg0: i32) -> (i32, i32) {
    %c0_i32 = arith.constant 0 : i32
    %c0_i32_0 = arith.constant 0 : i32
    %c0_i32_1 = arith.constant 0 : i32
    return %c0_i32, %c0_i32_0 : i32, i32
  }
  func.func @transform_2(%arg0: i32) -> (i32, i32) {
    %c0_i32 = arith.constant 0 : i32
    %c0_i32_0 = arith.constant 0 : i32
    %c0_i32_1 = arith.constant 0 : i32
    return %c0_i32, %c0_i32_0 : i32, i32
  }
  func.func @transform_3(%arg0: i32) -> (i32, i32) {
    %c0_i32 = arith.constant 0 : i32
    %c0_i32_0 = arith.constant 0 : i32
    %c0_i32_1 = arith.constant 0 : i32
    return %c0_i32, %c0_i32_0 : i32, i32
  }
  func.func @transform_4(%arg0: i32) -> (i32, i32) {
    %c0_i32 = arith.constant 0 : i32
    %c0_i32_0 = arith.constant 0 : i32
    return %arg0, %c0_i32 : i32, i32
  }
  func.func @transform_5(%arg0: i32) -> (i32, i32) {
    %c0_i32 = arith.constant 0 : i32
    %c0_i32_0 = arith.constant 0 : i32
    return %arg0, %c0_i32 : i32, i32
  }
  func.func @transform_6(%arg0: i32) -> (i32, i32) {
    %c0_i32 = arith.constant 0 : i32
    %c0_i32_0 = arith.constant 0 : i32
    return %c0_i32, %arg0 : i32, i32
  }
  func.func @transform_7(%arg0: i32) -> (i32, i32) {
    %c0_i32 = arith.constant 0 : i32
    %c0_i32_0 = arith.constant 0 : i32
    return %c0_i32, %arg0 : i32, i32
  }
}

</mosaic_0001>

<bundles_post_ra>
// kernel: _hysteresis_forward.1
= control target key start
LH: loop header
LB: loop body
LE: loop exit
PB: predicated region body
PF: predicated region fallthrough
CT: control target
= control target key end

     0   :  { %12 = vsyncpa [#allocation5], 0  ;;  %s429_s27 = smov [#allocation4]   ;;  %s561_s0 = inlined_call_operand.vmem [shape: f32[3], index: 0, kind: input, shape index: {}]   ;;  %s562_s1 = inlined_call_operand.vmem [shape: f32[1,128], index: 1, kind: input, shape index: {}]   ;;  %s563_s2 = inlined_call_operand.vmem [shape: f32[1,128], index: 2, kind: input, shape index: {}]   ;;  %s564_s3 = inlined_call_operand.vmem [shape: bf16[1,128], index: 3, kind: input, shape index: {}]   ;;  %s565_s4 = inlined_call_operand.vmem [shape: f32[16,1], index: 4, kind: input, shape index: {}]   ;;  %s566_s5 = inlined_call_operand.vmem [shape: f32[16,1], index: 5, kind: input, shape index: {}]   ;;  %s567_s6 = inlined_call_operand.vmem [shape: f32[1,16], index: 6, kind: input, shape index: {}]   ;;  %s568_s7 = inlined_call_operand.vmem [shape: f32[1,16], index: 7, kind: output, shape index: {}]  }
   0x1   :  { %s18_s26 = sshll.u32 %s561_s0, 4  ;;  %s19_s26 = int_to_ptr.vmem [resolvable:$true] %s18_s26 }
   0x2   :  { %21 = dma.vmem_to_smem %s19_s26, 16, %s429_s27, [#allocation5]  }
   0x3   :  { %427 = dma.done.wait [#allocation5], 16  }
   0x4   :  { %428 = vsyncadd [#allocation5], 4294967280 }
   0x5   :  { %38 = sfence }
   0x6   :  { %v55_v0 = vld [vmem:[%s565_s4] sm:$0xff]  ;;  %v56_v1 = vld [vmem:[%s565_s4 + $0x8] sm:$0xff]  ;;  %v430_v2 = vmov 0   ;;  %v431_v15 = vmov -1.0   ;;  %vm325_vm8 = vcmask 1040384   ;;  %vm327_vm9 = vcmask 1041408  }
   0x7   :  { %405 = vset.pattern.permute.xlu0 %v430_v2  ;;  %406 = vset.pattern.permute.xlu1 %v430_v2  ;;  %v57_v3 = vld [vmem:[%s566_s5] sm:$0xff]  ;;  %v58_v4 = vld [vmem:[%s566_s5 + $0x8] sm:$0xff]  ;;  %47 = vst [vmem:[#allocation2] sm:$0x1] %v431_v15  ;;  %vm329_vm10 = vcmask 1042432   ;;  %vm331_vm11 = vcmask 1043456  }
   0x8   :  { %61 = vperm.xlu0 %405, %v55_v0   ;;  %66 = vperm.xlu1 %406, %v56_v1   ;;  %v48_v5 = vld [vmem:[%s562_s1] sm:$0x1]  ;;  %vm333_vm12 = vcmask 1044480   ;;  %vm335_vm13 = vcmask 1045504   ;;  %vm337_vm14 = vcmask 1046528   ;;  %s388_s5 = sld [smem:[#allocation4 + $0x1]] }
   0x9   :  { %v49_v6 = vld [vmem:[%s563_s2] sm:$0x1]  ;;  %s389_s15 = sld [smem:[#allocation4 + $0x2]]  ;;  %vm381_vm15 = vcmask 122880  }
   0xa   :  { %v52_v7 = vadd.f32 %v49_v6, %v48_v5  ;;  %v50_v9 = vsub.f32 %v48_v5, %v49_v6  ;;  %s40_s16 = sld [smem:[#allocation4]] }
   0xc   :  { %v53_v8 = vmul.f32 0.5, %v52_v7  ;;  %v51_v11 = vmul.f32 0.5, %v50_v9 }
   0xe   :  { %v70_v10 = vperm.slane %v53_v8, 0  ;;  %v75_v14 = vperm.slane %v51_v11, 0  ;;  %v54_v11 = vld [vmem:[#allocation2] sm:$0x1] }
  0x10   :  { %81 = vperm.xlu0 %405, %v57_v3   ;;  %86 = vperm.xlu1 %406, %v58_v4  }
  0x7a   :  { %v62_v12 = vpop.permute.xlu0 %61  ;;  %v67_v35 = vpop.permute.xlu1 %66 }
  0x7b   :  { %v72_v13 = vmul.f32 %v70_v10, %v62_v12  ;;  %v73_v36 = vmul.f32 %v70_v10, %v67_v35 }
  0x7d   :  { %v77_v16 = vadd.f32 %v75_v14, %v72_v13  ;;  %v78_v37 = vadd.f32 %v75_v14, %v73_v36 }
  0x82   :  { %v82_v17 = vpop.permute.xlu0 %81  ;;  %v87_v44 = vpop.permute.xlu1 %86 }
  0x83   :  { %v89_v18 = vsub.f32 %v82_v17, %v77_v16  ;;  %v90_v45 = vsub.f32 %v87_v44, %v78_v37 }
  0x85   :  { %v390_v19 = vmul.f32 -1.442695, %v89_v18  ;;  %v391_v46 = vmul.f32 -1.442695, %v90_v45 }
  0x87   :  { %407 = vpow2.f32 %v390_v19 }
  0x8d   :  { %v408_v20 = vpop.eup %407 }
  0x8e   :  { %v97_v21 = vadd.f32 1.0, %v408_v20 }
  0x90   :  { %409 = vrcp.f32 %v97_v21  ;;  %v110_v25 = vand.u32 2147483648, %v97_v21  ;;  %v108_v27 = vand.u32 2147483647, %v97_v21  ;;  %vm104_vm1 = vweird.f32 %v97_v21 }
  0x91   :  { %411 = vpow2.f32 %v391_v46 }
  0x92   :  { %v111_v29 = vor.u32 1.1754944e-38, %v110_v25  ;;  %vm109_vm3 = vcmp.eq.f32.partialorder %v108_v27, 8.507059e+37 }
  0x96   :  { %v410_v22 = vpop.eup %409 }
  0x97   :  { %v100_v23 = vmul.f32 %v410_v22, %v97_v21  ;;  %vm105_vm0 = vweird.f32 %v410_v22  ;;  %v412_v49 = vpop.eup %411 }
  0x98   :  { %vm106_vm2 = vmor %vm104_vm1, %vm105_vm0  ;;  %v98_v50 = vadd.f32 1.0, %v412_v49 }
  0x99   :  { %v101_v24 = vsub.f32 1.0, %v100_v23 }
  0x9a   :  { %413 = vrcp.f32 %v98_v50  ;;  %vm119_vm4 = vweird.f32 %v98_v50  ;;  %v125_v58 = vand.u32 2147483648, %v98_v50  ;;  %v123_v60 = vand.u32 2147483647, %v98_v50 }
  0x9b   :  { %v102_v26 = vmul.f32 %v410_v22, %v101_v24 }
  0x9c   :  { %v126_v61 = vor.u32 1.1754944e-38, %v125_v58  ;;  %vm124_vm7 = vcmp.eq.f32.partialorder %v123_v60, 8.507059e+37 }
  0x9d   :  { %v103_v28 = vadd.f32 %v410_v22, %v102_v26 }
  0x9f   :  { %v107_v30 = vsel %vm106_vm2, %v410_v22, %v103_v28 }
  0xa0   :  { %v112_v31 = vsel %vm109_vm3, %v111_v29, %v107_v30  ;;  %v414_v52 = vpop.eup %413 }
  0xa1   :  { %v493_v32 = vmul.f32 %v112_v31, %v62_v12  ;;  %v115_v54 = vmul.f32 %v414_v52, %v98_v50  ;;  %vm120_vm5 = vweird.f32 %v414_v52 }
  0xa2   :  { %vm121_vm6 = vmor %vm119_vm4, %vm120_vm5 }
  0xa3   :  { %v131_v33 = vand.u32 2147483647, %v493_v32  ;;  %v116_v55 = vsub.f32 1.0, %v115_v54 }
  0xa5   :  { %v496_v34 = vsub.f32 1.0, %v131_v33  ;;  %v117_v57 = vmul.f32 %v414_v52, %v116_v55 }
  0xa7   :  { %136 = vst [vmem:[#allocation1] sm:$0xff] %v496_v34  ;;  %v118_v59 = vadd.f32 %v414_v52, %v117_v57  ;;  %v133_v12 = vmul.f32 %v496_v34, %v54_v11 }
  0xa9   :  { %v122_v63 = vsel %vm121_vm6, %v414_v52, %v118_v59  ;;  %v134_v13 = vadd.f32 %v133_v12, %v493_v32 }
  0xaa   :  { %v127_v0 = vsel %vm124_vm7, %v126_v61, %v122_v63 }
  0xab   :  { %v130_v1 = vmul.f32 %v127_v0, %v67_v35 }
  0xad   :  { %v207_v3 = vand.u32 2147483647, %v130_v1 }
  0xae   :  { %v499_v38 = vld [vmem:[#allocation1 + $0x1] ss:$9 sm:$0xff] }
  0xaf   :  { %142 = vst [vmem:[#allocation1] sm:$0xff] %v493_v32  ;;  %v208_v4 = vsub.f32 1.0, %v207_v3  ;;  %v140_v15 = vmul.f32 %v499_v38, %v134_v13 }
  0xb6   :  { %v502_v39 = vld [vmem:[#allocation1 + $0x1] ss:$9 sm:$0xff] }
  0xb7   :  { %147 = vst [vmem:[#allocation1] sm:$0xff] %v496_v34  ;;  %v146_v16 = vadd.f32 %v502_v39, %v140_v15 }
  0xbe   :  { %v505_v40 = vld [vmem:[#allocation1 + $0x2] ss:$9 sm:$0xff] }
  0xbf   :  { %152 = vst [vmem:[#allocation1] sm:$0xff] %v493_v32  ;;  %v151_v17 = vmul.f32 %v505_v40, %v146_v16 }
  0xc6   :  { %v508_v41 = vld [vmem:[#allocation1 + $0x2] ss:$9 sm:$0xff] }
  0xc7   :  { %157 = vst [vmem:[#allocation1] sm:$0xff] %v496_v34  ;;  %v156_v18 = vadd.f32 %v508_v41, %v151_v17 }
  0xc9   :  { %v287_v49 = vperm.slane %v156_v18, 0 }
  0xce   :  { %v511_v42 = vld [vmem:[#allocation1 + $0x3] ss:$9 sm:$0xff] }
  0xcf   :  { %162 = vst [vmem:[#allocation1] sm:$0xff] %v493_v32  ;;  %v161_v20 = vmul.f32 %v511_v42, %v156_v18 }
  0xd6   :  { %v514_v43 = vld [vmem:[#allocation1 + $0x3] ss:$9 sm:$0xff] }
  0xd7   :  { %167 = vst [vmem:[#allocation1] sm:$0xff] %v496_v34  ;;  %v166_v21 = vadd.f32 %v514_v43, %v161_v20  ;;  %v373_v20 = vstv %s389_s15 }
  0xde   :  { %v169_v47 = vld [vmem:[#allocation1 + $0x4] ss:$9 sm:$0xff] }
  0xdf   :  { %172 = vst [vmem:[#allocation1] sm:$0xff] %v493_v32  ;;  %v171_v22 = vmul.f32 %v169_v47, %v166_v21 }
  0xe6   :  { %v174_v48 = vld [vmem:[#allocation1 + $0x4] ss:$9 sm:$0xff] }
  0xe7   :  { %177 = vst [vmem:[#allocation1] sm:$0xff] %v496_v34  ;;  %v532_v23 = vadd.f32 %v174_v48, %v171_v22  ;;  %v284_v48 = vperm.slane %v146_v16, 0  ;;  %v378_v22 = vstv %s388_s5 }
  0xe9   :  { %v326_v55 = vsel %vm325_vm8, %v134_v13, %v284_v48  ;;  %v293_v58 = vperm.slane %v532_v23, 0 }
  0xea   :  { %v328_v57 = vsel %vm327_vm9, %v326_v55, %v287_v49 }
  0xee   :  { %v179_v51 = vld [vmem:[#allocation1 + $0x5] ss:$9 sm:$0xff] }
  0xef   :  { %182 = vst [vmem:[#allocation1] sm:$0xff] %v493_v32  ;;  %v181_v25 = vmul.f32 %v179_v51, %v532_v23  ;;  %v290_v51 = vperm.slane %v166_v21, 0  ;;  %v377_v21 = vld [vmem:[%s567_s6] sm:$0x1] }
  0xf1   :  { %v330_v60 = vsel %vm329_vm10, %v328_v57, %v290_v51 }
  0xf6   :  { %v184_v53 = vld [vmem:[#allocation1 + $0x5] ss:$9 sm:$0xff] }
  0xf7   :  { %187 = vst [vmem:[#allocation1] sm:$0xff] %v496_v34  ;;  %v535_v26 = vadd.f32 %v184_v53, %v181_v25 }
  0xfe   :  { %v189_v56 = vld [vmem:[#allocation1 + $0x6] ss:$9 sm:$0xff] }
  0xff   :  { %192 = vst [vmem:[#allocation1] sm:$0xff] %v493_v32  ;;  %v191_v27 = vmul.f32 %v189_v56, %v535_v26 }
 0x106   :  { %v194_v62 = vld [vmem:[#allocation1 + $0x6] ss:$9 sm:$0xff] }
 0x107   :  { %197 = vst [vmem:[#allocation1] sm:$0xff] %v496_v34  ;;  %v538_v28 = vadd.f32 %v194_v62, %v191_v27  ;;  %v296_v62 = vperm.slane %v535_v26, 0  ;;  %v379_v26 = vmul.f32 %v378_v22, %v377_v21 }
 0x10e   :  { %v199_v2 = vld [vmem:[#allocation1 + $0x7] ss:$9 sm:$0xff] }
 0x10f   :  { %202 = vst [vmem:[#allocation1] sm:$0xff] %v493_v32  ;;  %v201_v30 = vmul.f32 %v199_v2, %v538_v28  ;;  %v299_v2 = vperm.slane %v538_v28, 0 }
 0x116   :  { %v204_v5 = vld [vmem:[#allocation1 + $0x7] ss:$9 sm:$0xff] }
 0x117   :  { %212 = vst [vmem:[#allocation1] sm:$0xff] %v208_v4  ;;  %v206_v31 = vadd.f32 %v204_v5, %v201_v30 }
 0x119   :  { %v209_v32 = vmul.f32 %v208_v4, %v206_v31 }
 0x11b   :  { %v210_v34 = vadd.f32 %v209_v32, %v130_v1 }
 0x11e   :  { %v214_v6 = vld [vmem:[#allocation1 + $0x1] ss:$9 sm:$0xff] }
 0x11f   :  { %218 = vst [vmem:[#allocation1] sm:$0xff] %v130_v1  ;;  %v216_v35 = vmul.f32 %v214_v6, %v210_v34  ;;  %v302_v6 = vperm.slane %v206_v31, 0 }
 0x126   :  { %v220_v7 = vld [vmem:[#allocation1 + $0x1] ss:$9 sm:$0xff] }
 0x127   :  { %223 = vst [vmem:[#allocation1] sm:$0xff] %v208_v4  ;;  %v222_v36 = vadd.f32 %v220_v7, %v216_v35 }
 0x129   :  { %v305_v52 = vperm.slane %v222_v36, 0 }
 0x12b   :  { %v339_v0 = vsel %vm325_vm8, %v210_v34, %v305_v52 }
 0x12e   :  { %v225_v8 = vld [vmem:[#allocation1 + $0x2] ss:$9 sm:$0xff] }
 0x12f   :  { %228 = vst [vmem:[#allocation1] sm:$0xff] %v130_v1  ;;  %v227_v38 = vmul.f32 %v225_v8, %v222_v36  ;;  %v332_v8 = vsel %vm331_vm11, %v330_v60, %v293_v58 }
 0x130   :  { %v334_v11 = vsel %vm333_vm12, %v332_v8, %v296_v62 }
 0x131   :  { %v336_v13 = vsel %vm335_vm13, %v334_v11, %v299_v2 }
 0x132   :  { %v338_v15 = vsel %vm337_vm14, %v336_v13, %v302_v6 }
 0x136   :  { %v230_v9 = vld [vmem:[#allocation1 + $0x2] ss:$9 sm:$0xff] }
 0x137   :  { %233 = vst [vmem:[#allocation1] sm:$0xff] %v208_v4  ;;  %v232_v39 = vadd.f32 %v230_v9, %v227_v38 }
 0x139   :  { %v308_v54 = vperm.slane %v232_v39, 0 }
 0x13e   :  { %v235_v10 = vld [vmem:[#allocation1 + $0x3] ss:$9 sm:$0xff] }
 0x13f   :  { %238 = vst [vmem:[#allocation1] sm:$0xff] %v130_v1  ;;  %v237_v40 = vmul.f32 %v235_v10, %v232_v39 }
 0x146   :  { %v240_v14 = vld [vmem:[#allocation1 + $0x3] ss:$9 sm:$0xff] }
 0x147   :  { %243 = vst [vmem:[#allocation1] sm:$0xff] %v208_v4  ;;  %v242_v41 = vadd.f32 %v240_v14, %v237_v40 }
 0x149   :  { %v311_v56 = vperm.slane %v242_v41, 0 }
 0x14e   :  { %v245_v19 = vld [vmem:[#allocation1 + $0x4] ss:$9 sm:$0xff] }
 0x14f   :  { %248 = vst [vmem:[#allocation1] sm:$0xff] %v130_v1  ;;  %v247_v43 = vmul.f32 %v245_v19, %v242_v41  ;;  %v351_v19 = vld [vmem:[%s564_s3] sm:$0x1] }
 0x156   :  { %v250_v24 = vld [vmem:[#allocation1 + $0x4] ss:$9 sm:$0xff] }
 0x157   :  { %253 = vst [vmem:[#allocation1] sm:$0xff] %v208_v4  ;;  %v252_v44 = vadd.f32 %v250_v24, %v247_v43  ;;  %v375_v24 = vstv %s40_s16 }
 0x159   :  { %v314_v59 = vperm.slane %v252_v44, 0 }
 0x15e   :  { %v255_v29 = vld [vmem:[#allocation1 + $0x5] ss:$9 sm:$0xff] }
 0x15f   :  { %258 = vst [vmem:[#allocation1] sm:$0xff] %v130_v1  ;;  %v257_v45 = vmul.f32 %v255_v29, %v252_v44 }
 0x166   :  { %v260_v33 = vld [vmem:[#allocation1 + $0x5] ss:$9 sm:$0xff] }
 0x167   :  { %263 = vst [vmem:[#allocation1] sm:$0xff] %v208_v4  ;;  %v262_v46 = vadd.f32 %v260_v33, %v257_v45 }
 0x169   :  { %v317_v63 = vperm.slane %v262_v46, 0 }
 0x16e   :  { %v265_v37 = vld [vmem:[#allocation1 + $0x6] ss:$9 sm:$0xff] }
 0x16f   :  { %268 = vst [vmem:[#allocation1] sm:$0xff] %v130_v1  ;;  %v267_v50 = vmul.f32 %v265_v37, %v262_v46 }
 0x176   :  { %v270_v42 = vld [vmem:[#allocation1 + $0x6] ss:$9 sm:$0xff] }
 0x177   :  { %273 = vst [vmem:[#allocation1] sm:$0xff] %v208_v4  ;;  %v272_v53 = vadd.f32 %v270_v42, %v267_v50  ;;  %v340_v4 = vsel %vm327_vm9, %v339_v0, %v308_v54 }
 0x178   :  { %v341_v7 = vsel %vm329_vm10, %v340_v4, %v311_v56 }
 0x179   :  { %v320_v3 = vperm.slane %v272_v53, 0  ;;  %v342_v9 = vsel %vm331_vm11, %v341_v7, %v314_v59 }
 0x17a   :  { %v343_v12 = vsel %vm333_vm12, %v342_v9, %v317_v63 }
 0x17b   :  { %v344_v14 = vsel %vm335_vm13, %v343_v12, %v320_v3 }
 0x17e   :  { %v275_v47 = vld [vmem:[#allocation1 + $0x7] ss:$9 sm:$0xff] }
 0x17f   :  { %278 = vst [vmem:[#allocation1] sm:$0xff] %v130_v1  ;;  %v277_v61 = vmul.f32 %v275_v47, %v272_v53 }
 0x186   :  { %v280_v1 = vld [vmem:[#allocation1 + $0x7] ss:$9 sm:$0xff] }
 0x187   :  { %v282_v5 = vadd.f32 %v280_v1, %v277_v61 }
 0x189   :  { %v323_v10 = vperm.slane %v282_v5, 0  ;;  %350 = vst [vmem:[#allocation2] sm:$0x1] %v282_v5 }
 0x18b   :  { %v345_v16 = vsel %vm337_vm14, %v344_v14, %v323_v10 }
 0x18c   :  { %v400_v17 = vpack.c.bf16 %v345_v16, %v338_v15 }
 0x18e   :  { %401 = vst [vmem:[#allocation3] sm:$0xff] %v400_v17  }
 0x195   :  { %v396_v18 = vld [vmem:[#allocation3] sm:$0xff] }
 0x196   :  { %367 = vmatpush.bf16.xpose.msra.mxu0 %v396_v18 }
 0x19d   :  { %368 = vmatmul.bf16.vlgmr.msra.gmra.mxu0 %v351_v19 }
 0x21a   :  { %v369_v23 = vpop.f32.mrf.mxu0 }
 0x21b   :  { %v374_v25 = vmul.f32 %v373_v20, %v369_v23 }
 0x21d   :  { %v376_v27 = vadd.f32 %v375_v24, %v374_v25 }
 0x21f   :  { %v380_v28 = vadd.f32 %v379_v26, %v376_v27 }
 0x221   :  { %382 = vst.msk [vmem:[%s568_s7] sm:$0x1] %vm381_vm15, %v380_v28 }
 0x222   :  { %v371_v29 = vpop.f32.mrf.mxu0 }
 0x223   :  { %387 = vsyncpa [#allocation5], 1 }

</bundles_post_ra>
